<compile_context>
chip_gen: v6e
topology: v6e:2x2x1
jax: 0.10.0
libtpu: 0.0.40
codegen_flags: <defaults>
</compile_context>

<pallas_src>
import functools

import jax
import jax.numpy as jnp
from jax.experimental import pallas as pl
from jax.experimental.pallas import tpu as pltpu

LANES = 128
SUBLANES = 8


def _detect_tpu_params():
    """Per-generation knobs: (num_core_slices, tile_rows, vmem_limit_bytes)."""
    kind = ""
    try:
        kind = jax.devices()[0].device_kind.lower()
    except Exception:
        pass
    if "v7" in kind or "7x" in kind:
        # v7x: 2 TensorCores/chip, 64 MiB VMEM per TC.
        # 8 MiB/input block -> 32 MiB with double buffering, under a 48 MiB cap.
        return 2, 16384, 48 * 1024 * 1024
    # v5e / v6e (and fallback): 1 TC, 128 MiB physical VMEM.
    # 4 MiB/input block -> 16 MiB with double buffering, 64 MiB scoped cap.
    return 1, 8192, 64 * 1024 * 1024


_NUM_CORES, _TILE_ROWS, _VMEM_LIMIT = _detect_tpu_params()


def _mse_partial_sums_kernel(x1_ref, x2_ref, out_ref, *, tile_rows,
                             blocks_per_core, total_rows, need_mask,
                             split_cores):
    if split_cores:
        c = pl.program_id(0)   # core axis (CORE_PARALLEL)
        i = pl.program_id(1)   # reduction axis (ARBITRARY)
        block_idx = c * blocks_per_core + i
    else:
        i = pl.program_id(0)   # reduction axis
        block_idx = i

    # out_ref is this core-slice's (1, 8, 128) partial-sum block; it stays
    # resident across the whole reduction axis (same block index for all i).
    @pl.when(i == 0)
    def _():
        out_ref[...] = jnp.zeros_like(out_ref)

    d = x1_ref[...].astype(jnp.float32) - x2_ref[...].astype(jnp.float32)
    sq = d * d

    def accumulate(vals):
        # Fold the (tile_rows, 128) block into the (1, 8, 128) accumulator:
        # pure vreg-shaped VPU adds, no cross-lane XLU work in the hot loop.
        out_ref[...] += vals.reshape(
            tile_rows // SUBLANES, SUBLANES, LANES).sum(axis=0, keepdims=True)

    if need_mask:
        row_start = block_idx * tile_rows
        in_bounds = row_start + tile_rows <= total_rows  # scalar

        # Fast path: interior blocks skip the mask entirely.
        @pl.when(in_bounds)
        def _():
            accumulate(sq)

        # Edge (or clamped/duplicated) block: select 0 for rows past the real
        # data (select, not multiply, so garbage/NaN in the OOB region is safe).
        @pl.when(jnp.logical_not(in_bounds))
        def _():
            row_idx = row_start + jax.lax.broadcasted_iota(jnp.int32, sq.shape, 0)
            accumulate(jnp.where(row_idx < total_rows, sq, 0.0))
    else:
        accumulate(sq)


@jax.jit
def mse_loss(x1, x2):
    assert x1.shape == x2.shape, "MSE_Loss requires matching shapes"
    n = x1.size  # true element count for the mean

    x1f = x1.reshape(-1)
    x2f = x2.reshape(-1)

    # Pad only when the flat size is not lane-aligned (n % 128 != 0) or the
    # whole input is smaller than one (8, 128) tile.  Lane-aligned inputs (the
    # common ML case) hit the kernel with zero extra HBM traffic; any ragged
    # trailing row-block is handled by the in-kernel edge mask instead of a pad.
    pad = (-n) % LANES
    if n + pad < SUBLANES * LANES:
        pad = SUBLANES * LANES - n
    if pad > 0:  # static at trace time
        # TODO(synk): a manual-DMA (memory_space=pl.ANY) tail path would avoid
        # this full-array copy for very large inputs whose size is not a
        # multiple of 128.  Zero padding contributes 0 to the sum.
        x1f = jnp.pad(x1f, (0, pad))
        x2f = jnp.pad(x2f, (0, pad))

    rows = (n + pad) // LANES            # >= 8; not necessarily a multiple of 8
    x1f = x1f.reshape(rows, LANES)
    x2f = x2f.reshape(rows, LANES)

    # Block row count: multiple of 8, <= rows, as big as the VMEM budget allows.
    tile_rows = min(_TILE_ROWS, (rows // SUBLANES) * SUBLANES)
    num_blocks = pl.cdiv(rows, tile_rows)
    row_edge = num_blocks * tile_rows != rows

    split_cores = _NUM_CORES > 1 and num_blocks >= _NUM_CORES
    if split_cores:
        num_slices = _NUM_CORES
        blocks_per_core = pl.cdiv(num_blocks, num_slices)
        need_mask = row_edge or (num_slices * blocks_per_core != num_blocks)
        grid = (num_slices, blocks_per_core)
        # Clamp fully out-of-range block indices to the last real block; their
        # contribution is zeroed by the in-kernel mask.
        in_map = lambda c, i: (jnp.minimum(c * blocks_per_core + i,
                                           num_blocks - 1), 0)
        out_map = lambda c, i: (c, 0, 0)
        dim_sem = (pltpu.CORE_PARALLEL, pltpu.ARBITRARY)
    else:
        num_slices = 1
        blocks_per_core = num_blocks
        need_mask = row_edge
        grid = (num_blocks,)
        in_map = lambda i: (i, 0)
        out_map = lambda i: (0, 0, 0)
        dim_sem = ("arbitrary",)

    kernel = functools.partial(
        _mse_partial_sums_kernel,
        tile_rows=tile_rows,
        blocks_per_core=blocks_per_core,
        total_rows=rows,
        need_mask=need_mask,
        split_cores=split_cores,
    )

    bytes_accessed = n * (x1.dtype.itemsize + x2.dtype.itemsize)
    partials = pl.pallas_call(
        kernel,
        out_shape=jax.ShapeDtypeStruct((num_slices, SUBLANES, LANES),
                                       jnp.float32),
        grid_spec=pltpu.PrefetchScalarGridSpec(
            num_scalar_prefetch=0,
            grid=grid,
            in_specs=[
                pl.BlockSpec((tile_rows, LANES), in_map),
                pl.BlockSpec((tile_rows, LANES), in_map),
            ],
            out_specs=pl.BlockSpec((1, SUBLANES, LANES), out_map),
        ),
        compiler_params=pltpu.CompilerParams(
            dimension_semantics=dim_sem,
            vmem_limit_bytes=_VMEM_LIMIT,
        ),
        cost_estimate=pl.CostEstimate(
            flops=3 * n, transcendentals=0, bytes_accessed=bytes_accessed),
    )(x1f, x2f)

    # Tiny final cross-lane reduce + mean in plain JAX (glue, not the hot path).
    return (jnp.sum(partials) / n).astype(jnp.float32)


def _check(shape, key):
    k1, k2 = jax.random.split(key)
    x1 = jax.random.normal(k1, shape, dtype=jnp.float32)
    x2 = jax.random.normal(k2, shape, dtype=jnp.float32)
    out = mse_loss(x1, x2)
    jax.block_until_ready(out)
    ref = jnp.mean((x1 - x2) ** 2)
    assert jnp.allclose(out, ref, rtol=1e-4, atol=1e-6), (shape, float(out),
                                                          float(ref))


if __name__ == "__main__":
    key = jax.random.PRNGKey(0)
    k0, k1, k2, k3, k4 = jax.random.split(key, 5)

    # Primary small NCHW-like loss input.
    _check((2, 4, 16, 16), k0)
    # Fully unaligned element count: exercises the (tiny) pad path.
    _check((2, 3, 7, 5), k1)
    # Lane-aligned but rows not a multiple of 8: zero-copy edge-mask path.
    _check((3, 5, 128), k2)
    # Larger aligned input: one big streaming block.
    _check((4, 16, 128, 128), k3)
    # Multi-block with ragged trailing block (and 2-core split/clamp on v7x).
    _check((32772, 128), k4)

    print("KERNEL_OK")
</pallas_src>

<mosaic_0001>
module attributes {stable_mosaic.version = 11 : i64} {
  func.func @_mse_partial_sums_kernel(%arg0: i32, %arg1: memref<16x128xf32, #tpu.memory_space<vmem>>, %arg2: memref<16x128xf32, #tpu.memory_space<vmem>>, %arg3: memref<1x8x128xf32, #tpu.memory_space<vmem>>) attributes {dimension_semantics = [#tpu.dimension_semantics<arbitrary>], iteration_bounds = array<i64: 1>, scalar_prefetch = 0 : i64, scratch_operands = 0 : i64, tpu.core_type = #tpu.core_type<tc>, window_params = [{transform_indices = @transform_0, window_bounds = array<i64: 16, 128>}, {transform_indices = @transform_1, window_bounds = array<i64: 16, 128>}, {pipeline_mode = #tpu.pipeline_mode<synchronous>, transform_indices = @transform_2, window_bounds = array<i64: 1, 8, 128>}]} {
    %c0_i32 = arith.constant 0 : i32
    %0 = arith.cmpi eq, %arg0, %c0_i32 : i32
    %1 = arith.extui %0 : i1 to i32
    %c0_i32_0 = arith.constant 0 : i32
    %2 = arith.cmpi ne, %1, %c0_i32_0 : i32
    scf.if %2 {
      %cst_10 = arith.constant 0.000000e+00 : f32
      %13 = vector.broadcast %cst_10 : f32 to vector<1x8x128xf32>
      %c0_11 = arith.constant 0 : index
      %c0_12 = arith.constant 0 : index
      %c0_13 = arith.constant 0 : index
      %14 = vector.load %arg3[%c0_11, %c0_12, %c0_13] : memref<1x8x128xf32, #tpu.memory_space<vmem>>, vector<1x8x128xf32>
      tpu.vector_store %arg3[%c0_11, %c0_12, %c0_13], %13 {strides = array<i32>} : memref<1x8x128xf32, #tpu.memory_space<vmem>>, vector<1x8x128xf32>,
    } else {
    }
    %c0 = arith.constant 0 : index
    %c0_1 = arith.constant 0 : index
    %3 = vector.load %arg1[%c0, %c0_1] : memref<16x128xf32, #tpu.memory_space<vmem>>, vector<16x128xf32>
    %c0_2 = arith.constant 0 : index
    %c0_3 = arith.constant 0 : index
    %4 = vector.load %arg2[%c0_2, %c0_3] : memref<16x128xf32, #tpu.memory_space<vmem>>, vector<16x128xf32>
    %5 = arith.subf %3, %4 : vector<16x128xf32>
    %6 = arith.mulf %5, %5 : vector<16x128xf32>
    %c0_4 = arith.constant 0 : index
    %c0_5 = arith.constant 0 : index
    %c0_6 = arith.constant 0 : index
    %7 = vector.load %arg3[%c0_4, %c0_5, %c0_6] : memref<1x8x128xf32, #tpu.memory_space<vmem>>, vector<1x8x128xf32>
    %8 = vector.shape_cast %6 : vector<16x128xf32> to vector<2x8x128xf32>
    %cst = arith.constant dense<0.000000e+00> : vector<8x128xf32>
    %9 = vector.multi_reduction <add>, %8, %cst [0] : vector<2x8x128xf32> to vector<8x128xf32>
    %10 = vector.shape_cast %9 : vector<8x128xf32> to vector<1x8x128xf32>
    %11 = arith.addf %7, %10 : vector<1x8x128xf32>
    %c0_7 = arith.constant 0 : index
    %c0_8 = arith.constant 0 : index
    %c0_9 = arith.constant 0 : index
    %12 = vector.load %arg3[%c0_7, %c0_8, %c0_9] : memref<1x8x128xf32, #tpu.memory_space<vmem>>, vector<1x8x128xf32>
    tpu.vector_store %arg3[%c0_7, %c0_8, %c0_9], %11 {strides = array<i32>} : memref<1x8x128xf32, #tpu.memory_space<vmem>>, vector<1x8x128xf32>,
    return
  }
  func.func @transform_0(%arg0: i32) -> (i32, i32) {
    %c0_i32 = arith.constant 0 : i32
    %c0_i32_0 = arith.constant 0 : i32
    return %arg0, %c0_i32 : i32, i32
  }
  func.func @transform_1(%arg0: i32) -> (i32, i32) {
    %c0_i32 = arith.constant 0 : i32
    %c0_i32_0 = arith.constant 0 : i32
    return %arg0, %c0_i32 : i32, i32
  }
  func.func @transform_2(%arg0: i32) -> (i32, i32, i32) {
    %c0_i32 = arith.constant 0 : i32
    %c0_i32_0 = arith.constant 0 : i32
    %c0_i32_1 = arith.constant 0 : i32
    %c0_i32_2 = arith.constant 0 : i32
    return %c0_i32, %c0_i32_0, %c0_i32_1 : i32, i32, i32
  }
}

</mosaic_0001>

<bundles_post_ra>
// kernel: mse_loss.1
= control target key start
LH: loop header
LB: loop body
LE: loop exit
PB: predicated region body
PF: predicated region fallthrough
CT: control target
= control target key end

     0   :  { %s63_s0 = inlined_call_operand.vmem [shape: f32[16,128], index: 0, kind: input, shape index: {}]   ;;  %s64_s1 = inlined_call_operand.vmem [shape: f32[16,128], index: 1, kind: input, shape index: {}]   ;;  %s65_s2 = inlined_call_operand.vmem [shape: f32[1,8,128], index: 2, kind: output, shape index: {}]  }
   0x1   :  { %v16_v0 = vld [vmem:[%s63_s0] sm:$0xff]  ;;  %v17_v1 = vld [vmem:[%s63_s0 + $0x8] sm:$0xff] }
   0x2   :  { %v18_v2 = vld [vmem:[%s64_s1] sm:$0xff]  ;;  %v19_v3 = vld [vmem:[%s64_s1 + $0x8] sm:$0xff] }
   0x3   :  { %v20_v4 = vsub.f32 %v16_v0, %v18_v2  ;;  %v21_v5 = vsub.f32 %v17_v1, %v19_v3 }
   0x5   :  { %v22_v6 = vmul.f32 %v20_v4, %v20_v4  ;;  %v23_v7 = vmul.f32 %v21_v5, %v21_v5 }
   0x7   :  { %v25_v8 = vadd.f32 %v23_v7, %v22_v6 }
   0x9   :  { %27 = vst [vmem:[%s65_s2] sm:$0xff] %v25_v8 }

</bundles_post_ra>
